<compile_context>
chip_gen: v7x
topology: tpu7x:2x2x1
jax: 0.10.0
libtpu: 0.0.40
codegen_flags: <defaults>
</compile_context>

<pallas_src>
import jax
import jax.numpy as jnp
from jax.experimental import pallas as pl
from jax.experimental.pallas import tpu as pltpu


def _identity_kernel(x_ref, o_ref):
    # Elementwise pass-through on the current VMEM tile.
    o_ref[...] = x_ref[...]


_TARGET_TILE_BYTES = 2 * 1024 * 1024  # ~2 MiB per block


def _pick_layout(total, itemsize):
    """Pick a lane-dense width and a sublane-aligned row count.

    Returns (lanes, rows, sublane_packing).  Prefers a factorization with no
    padding and the widest lane axis available.
    """
    sub = max(8, 32 // itemsize)  # sublane packing: 8 f32 / 16 bf16 / 32 int8
    for lanes in (8192, 4096, 2048, 1024, 512, 256, 128):
        if total % lanes == 0 and (total // lanes) % sub == 0:
            return lanes, total // lanes, sub
    # Fallback: fixed wide lane axis, pad rows up to a sublane multiple.
    lanes = 1024
    rows = pl.cdiv(total, lanes)
    rows = pl.cdiv(rows, sub) * sub
    return lanes, rows, sub


def feature_extraction_forward(x):
    """Identity forward of FeatureExtractionNetwork via a Pallas TPU kernel.

    NOTE: outside this exercise, `return x` is the correct implementation —
    the kernel only exists to demonstrate an optimized pallas_call identity.

    Args:
      x: jnp.ndarray of shape (N, C, H, W), any dtype.
    Returns:
      jnp.ndarray identical to x (same shape, dtype, values).
    """
    orig_shape = x.shape
    total = x.size
    if total == 0:
        return x

    itemsize = jnp.dtype(x.dtype).itemsize
    lanes, rows, sub = _pick_layout(total, itemsize)

    # Row tile sized so each block is ~2 MiB (amortizes per-step overhead),
    # kept a multiple of the sublane packing.
    max_rows = max(sub, (_TARGET_TILE_BYTES // (lanes * itemsize)) // sub * sub)
    tile_rows = min(max_rows, rows)
    # Round rows up to a multiple of tile_rows: no ragged (masked) last block.
    rows = pl.cdiv(rows, tile_rows) * tile_rows
    padded_total = rows * lanes

    flat = x.reshape(-1)
    if padded_total != total:
        flat = jnp.pad(flat, (0, padded_total - total))
    x2d = flat.reshape(rows, lanes)

    grid = (rows // tile_rows,)

    out2d = pl.pallas_call(
        _identity_kernel,
        out_shape=jax.ShapeDtypeStruct((rows, lanes), x.dtype),
        grid_spec=pltpu.PrefetchScalarGridSpec(
            num_scalar_prefetch=0,
            grid=grid,
            in_specs=[pl.BlockSpec((tile_rows, lanes), lambda i: (i, 0))],
            out_specs=pl.BlockSpec((tile_rows, lanes), lambda i: (i, 0)),
        ),
        # Alias the (temporary) 2D input buffer to the output: for a pure
        # identity XLA can then donate the buffer / elide the extra copy.
        input_output_aliases={0: 0},
        compiler_params=pltpu.CompilerParams(
            # "parallel" lets v7x shard the grid across its 2 TensorCores;
            # a no-op on single-TC v5e/v6e, so free to keep everywhere.
            dimension_semantics=("parallel",),
            # Explicit scoped-VMEM budget: 2 MiB blocks * (in + out) * double
            # buffering = 8 MiB live, so 32 MiB is safe on every generation
            # (raises v5e's 16 MiB default, fits v7x's 64 MiB physical).
            vmem_limit_bytes=32 * 1024 * 1024,
        ),
    )(x2d)

    out_flat = out2d.reshape(-1)
    if padded_total != total:
        out_flat = out_flat[:total]
    return out_flat.reshape(orig_shape)


if __name__ == "__main__":
    key = jax.random.PRNGKey(0)
    # Small NCHW input consistent with an object-detection feature extractor.
    x = jax.random.normal(key, (2, 4, 16, 16), dtype=jnp.float32)

    fwd = jax.jit(feature_extraction_forward)
    y = jax.block_until_ready(fwd(x))

    assert y.shape == x.shape and y.dtype == x.dtype
    assert bool(jnp.array_equal(y, x))
    print("KERNEL_OK")
</pallas_src>

<mosaic_0001>
module attributes {stable_mosaic.version = 11 : i64} {
  func.func @_identity_kernel(%arg0: i32, %arg1: memref<8x256xf32, #tpu.memory_space<vmem>>, %arg2: memref<8x256xf32, #tpu.memory_space<vmem>>) attributes {dimension_semantics = [#tpu.dimension_semantics<parallel>], iteration_bounds = array<i64: 1>, scalar_prefetch = 0 : i64, scratch_operands = 0 : i64, tpu.core_type = #tpu.core_type<tc>, window_params = [{transform_indices = @transform_0, window_bounds = array<i64: 8, 256>}, {transform_indices = @transform_1, window_bounds = array<i64: 8, 256>}]} {
    %c0 = arith.constant 0 : index
    %c0_0 = arith.constant 0 : index
    %0 = vector.load %arg1[%c0, %c0_0] : memref<8x256xf32, #tpu.memory_space<vmem>>, vector<8x256xf32>
    %c0_1 = arith.constant 0 : index
    %c0_2 = arith.constant 0 : index
    %1 = vector.load %arg2[%c0_1, %c0_2] : memref<8x256xf32, #tpu.memory_space<vmem>>, vector<8x256xf32>
    tpu.vector_store %arg2[%c0_1, %c0_2], %0 {strides = array<i32>} : memref<8x256xf32, #tpu.memory_space<vmem>>, vector<8x256xf32>,
    return
  }
  func.func @transform_0(%arg0: i32) -> (i32, i32) {
    %c0_i32 = arith.constant 0 : i32
    %c0_i32_0 = arith.constant 0 : i32
    return %arg0, %c0_i32 : i32, i32
  }
  func.func @transform_1(%arg0: i32) -> (i32, i32) {
    %c0_i32 = arith.constant 0 : i32
    %c0_i32_0 = arith.constant 0 : i32
    return %arg0, %c0_i32 : i32, i32
  }
}

</mosaic_0001>

<bundles_post_ra>
// kernel: feature_extraction_forward.1
= control target key start
LH: loop header
LB: loop body
LE: loop exit
PB: predicated region body
PF: predicated region fallthrough
CT: control target
= control target key end

     0   :  { %s38_s0 = inlined_call_operand.vmem [shape: f32[8,256], index: 0, kind: input, shape index: {}, may-alias: {0,1}]   ;;  %s39_s1 = inlined_call_operand.vmem [shape: f32[8,256], index: 1, kind: output, shape index: {}, may-alias: {0,1}]  }
   0x1   :  { %v8_v0 = vld [vmem:[%s38_s0] sm:$0xff]  ;;  %v9_v1 = vld [vmem:[%s38_s0 + $0x8] sm:$0xff] }
   0x2   :  { %10 = vst [vmem:[%s39_s1] sm:$0xff] %v8_v0  ;;  %11 = vst [vmem:[%s39_s1 + $0x8] sm:$0xff] %v9_v1 }

</bundles_post_ra>
